<compile_context>
chip_gen: v7x
topology: tpu7x:2x2x1
jax: 0.10.0
libtpu: 0.0.40
codegen_flags: <defaults>
</compile_context>

<pallas_src>
import math

import jax
import jax.numpy as jnp
from jax.experimental import pallas as pl
from jax.experimental.pallas import tpu as pltpu

LN_EPS = 1e-12  # BertLayerNorm eps


# ---------------------------------------------------------------- hardware-aware config
def _tpu_vmem_bytes():
    try:
        return int(pltpu.get_tpu_info().vmem_capacity_bytes)
    except Exception:
        return 64 * 1024 * 1024  # conservative fallback (works on every generation)


_VMEM_CAP = _tpu_vmem_bytes()
# leave ~24 MiB headroom for compiler scratch / spills; cap at 100 MiB on 128 MiB parts
VMEM_LIMIT = max(32 * 1024 * 1024, min(_VMEM_CAP - 24 * 1024 * 1024, 100 * 1024 * 1024))
_SMALL_VMEM = _VMEM_CAP <= 64 * 1024 * 1024  # v7x-class


# ---------------------------------------------------------------- math helpers
def _gelu_tanh(x):
    # tanh-approximation GELU: tanh lands on the EUP slot instead of a long VPU chain.
    c = 0.7978845608028654  # sqrt(2/pi)
    return 0.5 * x * (1.0 + jnp.tanh(c * (x + 0.044715 * x * x * x)))


def _layernorm(x, g, b):
    mean = jnp.mean(x, axis=-1, keepdims=True)
    var = jnp.mean(jnp.square(x - mean), axis=-1, keepdims=True)
    return (x - mean) * jax.lax.rsqrt(var + LN_EPS) * g + b


def _pick_tile(n, candidates):
    for t in candidates:
        if n % t == 0:
            return t
    # Fallback: whole dimension.  Guard against silently blowing the VMEM budget for odd sizes.
    assert n <= 1024, f"no tile candidate divides {n}; pad the input or extend candidates"
    return n


# ---------------------------------------------------------------- Pallas kernels
def layernorm_kernel(x_ref, g_ref, b_ref, o_ref):
    x = x_ref[...].astype(jnp.float32)
    o_ref[...] = _layernorm(x, g_ref[...], b_ref[...]).astype(o_ref.dtype)


def qkv_kernel(h_ref, w_ref, b_ref, o_ref):
    # Fused Q/K/V projection for one row tile: (tr, H) @ (H, 3H) + (1, 3H).
    # Weights are VMEM-resident (constant index_map); q columns are pre-scaled by 1/sqrt(dh).
    x = jnp.dot(h_ref[...], w_ref[...], preferred_element_type=jnp.float32) + b_ref[...]
    o_ref[...] = x.astype(o_ref.dtype)


def attn_kernel(h_ref, q_ref, kT_ref, v_ref, mb_ref, wo_ref, bo_ref, g_ref, be_ref, o_ref):
    nh = q_ref.shape[1]

    q = q_ref[0]                        # (nh, tq, dh) bf16, pre-scaled by 1/sqrt(dh)
    kT = kT_ref[0]                      # (nh, dh, S)  bf16  (S on lanes)
    v = v_ref[0]                        # (nh, S, dh)  bf16

    # head-batched scores / softmax / context
    s = jnp.einsum('hqd,hdk->hqk', q, kT,
                   preferred_element_type=jnp.float32)          # (nh, tq, S)
    s = s + mb_ref[...]                                          # (1, 1, S) additive mask
    s = s - jnp.max(s, axis=-1, keepdims=True)
    p = jnp.exp(s)
    p = p * pl.reciprocal(jnp.sum(p, axis=-1, keepdims=True), approx=True)

    ctx = jnp.einsum('hqk,hkd->hqd', p.astype(jnp.bfloat16), v,
                     preferred_element_type=jnp.float32)         # (nh, tq, dh)
    ctx = ctx.astype(jnp.bfloat16)

    # output projection: accumulate per-head (dh, H) matmuls directly into the
    # bias + residual (tq, H) f32 accumulator — no (nh, tq, H) intermediate.
    acc = bo_ref[...] + h_ref[0].astype(jnp.float32)             # (tq, H)
    for hd in range(nh):
        acc = acc + jnp.dot(ctx[hd], wo_ref[hd], preferred_element_type=jnp.float32)

    h1 = _layernorm(acc, g_ref[...], be_ref[...])
    o_ref[0] = h1.astype(o_ref.dtype)


def ffn_kernel(h1_ref, wi_ref, bi_ref, wp_ref, bp_ref, g_ref, be_ref, o_ref, acc_ref):
    ii = pl.program_id(1)

    @pl.when(ii == 0)
    def _():
        acc_ref[...] = jnp.zeros_like(acc_ref)

    h1 = h1_ref[...]                                             # (tr, H) bf16
    x = jnp.dot(h1, wi_ref[...], preferred_element_type=jnp.float32) + bi_ref[...]
    x = _gelu_tanh(x)
    acc_ref[...] += jnp.dot(x.astype(jnp.bfloat16), wp_ref[...],
                            preferred_element_type=jnp.float32)  # (tr, H)

    @pl.when(ii == pl.num_programs(1) - 1)
    def _():
        h2 = _layernorm(acc_ref[...] + bp_ref[...] + h1.astype(jnp.float32),
                        g_ref[...], be_ref[...])
        o_ref[...] = h2.astype(o_ref.dtype)


# ---------------------------------------------------------------- wrappers
def pallas_layernorm(x2d, g, b):
    R, H = x2d.shape
    tr = _pick_tile(R, (512, 256, 128, 64, 32, 16, 8))
    return pl.pallas_call(
        layernorm_kernel,
        grid=(R // tr,),
        in_specs=[pl.BlockSpec((tr, H), lambda i: (i, 0)),
                  pl.BlockSpec((1, H), lambda i: (0, 0)),
                  pl.BlockSpec((1, H), lambda i: (0, 0))],
        out_specs=pl.BlockSpec((tr, H), lambda i: (i, 0)),
        out_shape=jax.ShapeDtypeStruct((R, H), jnp.bfloat16),
        compiler_params=pltpu.CompilerParams(dimension_semantics=("parallel",)),
    )(x2d, g, b)


def pallas_qkv(h2d, wqkv, bqkv, tr):
    R, H = h2d.shape
    H3 = wqkv.shape[1]
    cost = pl.CostEstimate(
        flops=int(2 * R * H * H3),
        transcendentals=0,
        bytes_accessed=int(R * H * 2 + H * H3 * 2 + H3 * 4 + R * H3 * 2))
    return pl.pallas_call(
        qkv_kernel,
        grid=(R // tr,),
        in_specs=[pl.BlockSpec((tr, H), lambda r: (r, 0)),
                  pl.BlockSpec((H, H3), lambda r: (0, 0)),      # weight resident
                  pl.BlockSpec((1, H3), lambda r: (0, 0))],     # bias resident
        out_specs=pl.BlockSpec((tr, H3), lambda r: (r, 0)),
        out_shape=jax.ShapeDtypeStruct((R, H3), jnp.bfloat16),
        compiler_params=pltpu.CompilerParams(
            dimension_semantics=("parallel",), vmem_limit_bytes=VMEM_LIMIT),
        cost_estimate=cost,
    )(h2d, wqkv, bqkv)


def pallas_attention(h, qh, kT, vh, mask_bias, wo_r, bo, ln1g, ln1b, tq):
    B, S, H = h.shape
    nh, dh = qh.shape[1], qh.shape[3]
    n_q = S // tq
    cost = pl.CostEstimate(
        flops=int(4 * B * nh * S * S * dh + 2 * B * S * H * H),
        transcendentals=int(B * nh * S * S),
        bytes_accessed=int(5 * B * S * H * 2 + H * H * 2 + B * S * 4))
    return pl.pallas_call(
        attn_kernel,
        grid=(B, n_q),
        in_specs=[
            pl.BlockSpec((1, tq, H), lambda b, qi: (b, qi, 0)),        # residual tile (bf16)
            pl.BlockSpec((1, nh, tq, dh), lambda b, qi: (b, 0, qi, 0)),  # q tile
            pl.BlockSpec((1, nh, dh, S), lambda b, qi: (b, 0, 0, 0)),    # K^T, S on lanes
            pl.BlockSpec((1, nh, S, dh), lambda b, qi: (b, 0, 0, 0)),    # V
            pl.BlockSpec((1, 1, S), lambda b, qi: (b, 0, 0)),            # additive mask
            pl.BlockSpec((nh, dh, H), lambda b, qi: (0, 0, 0)),          # wo (resident)
            pl.BlockSpec((1, H), lambda b, qi: (0, 0)),                  # bo
            pl.BlockSpec((1, H), lambda b, qi: (0, 0)),                  # ln1 gamma
            pl.BlockSpec((1, H), lambda b, qi: (0, 0)),                  # ln1 beta
        ],
        out_specs=pl.BlockSpec((1, tq, H), lambda b, qi: (b, qi, 0)),
        out_shape=jax.ShapeDtypeStruct((B, S, H), jnp.bfloat16),
        compiler_params=pltpu.CompilerParams(
            dimension_semantics=("parallel", "parallel"), vmem_limit_bytes=VMEM_LIMIT),
        cost_estimate=cost,
    )(h, qh, kT, vh, mask_bias, wo_r, bo, ln1g, ln1b)


def pallas_ffn(h1_2d, wi, bi, wp, bp, ln2g, ln2b, tr, ti):
    R, H = h1_2d.shape
    I = wi.shape[1]
    n_r, n_i = R // tr, I // ti
    cost = pl.CostEstimate(
        flops=int(4 * R * H * I),
        transcendentals=int(R * I),
        bytes_accessed=int(2 * R * H * 2 + 2 * H * I * 2 + (I + 3 * H) * 4))
    return pl.pallas_call(
        ffn_kernel,
        grid=(n_r, n_i),
        in_specs=[
            pl.BlockSpec((tr, H), lambda r, ii: (r, 0)),     # h1 row tile (bf16)
            pl.BlockSpec((H, ti), lambda r, ii: (0, ii)),    # wi (resident when n_i == 1)
            pl.BlockSpec((1, ti), lambda r, ii: (0, ii)),    # bi
            pl.BlockSpec((ti, H), lambda r, ii: (ii, 0)),    # wp (resident when n_i == 1)
            pl.BlockSpec((1, H), lambda r, ii: (0, 0)),      # bp
            pl.BlockSpec((1, H), lambda r, ii: (0, 0)),      # ln2 gamma
            pl.BlockSpec((1, H), lambda r, ii: (0, 0)),      # ln2 beta
        ],
        out_specs=pl.BlockSpec((tr, H), lambda r, ii: (r, 0)),
        out_shape=jax.ShapeDtypeStruct((R, H), jnp.bfloat16),
        scratch_shapes=[pltpu.VMEM((tr, H), jnp.float32)],
        compiler_params=pltpu.CompilerParams(
            dimension_semantics=("parallel", "arbitrary"), vmem_limit_bytes=VMEM_LIMIT),
        cost_estimate=cost,
    )(h1_2d, wi, bi, wp, bp, ln2g, ln2b)


# ---------------------------------------------------------------- parameter packing (once)
def pack_bert_params(params, num_heads):
    """Repack f32 weights into the bf16 kernel layouts ONCE at parameter-load time."""
    H = params["word_emb"].shape[1]
    dh = H // num_heads
    scale = 1.0 / math.sqrt(dh)
    packed = {
        "word_emb": params["word_emb"], "pos_emb": params["pos_emb"],
        "tok_emb": params["tok_emb"],
        "emb_ln_g": params["emb_ln_g"], "emb_ln_b": params["emb_ln_b"],
        "num_heads": num_heads, "layers": [],
    }
    for p in params["layers"]:
        wqkv = jnp.concatenate([p["wq"] * scale, p["wk"], p["wv"]], axis=1).astype(jnp.bfloat16)
        bqkv = jnp.concatenate([p["bq"] * scale, p["bk"], p["bv"]], axis=1).astype(jnp.float32)
        packed["layers"].append({
            "wqkv": wqkv, "bqkv": bqkv,
            "wo_r": p["wo"].reshape(num_heads, dh, H).astype(jnp.bfloat16),
            "bo": p["bo"], "ln1g": p["ln1g"], "ln1b": p["ln1b"],
            "wi": p["wi"].astype(jnp.bfloat16), "bi": p["bi"],
            "wp": p["wp"].astype(jnp.bfloat16), "bp": p["bp"],
            "ln2g": p["ln2g"], "ln2b": p["ln2b"],
        })
    return packed


def _ffn_inter_tile(H, I):
    w_bytes = 2 * H * I * 2  # wi + wp in bf16
    if w_bytes <= VMEM_LIMIT // 3:
        return I  # keep full FFN weights VMEM-resident
    # TODO(synk): for BERT-large on v7x the weights are tiled here; bump the row tile instead.
    return _pick_tile(I, (2048, 1024, 512, 256, 128))


# ---------------------------------------------------------------- forward
def bert_forward(packed, x, segs, mask):
    """Bert.forward: returns top_vec = last encoder layer hidden states (B, S, H)."""
    B, S = x.shape
    H = packed["word_emb"].shape[1]
    nh = packed["num_heads"]
    dh = H // nh
    R = B * S

    pos = jnp.arange(S, dtype=jnp.int32)[None, :]
    # Embedding gathers are glue (plain JAX); the hot path below is Pallas.
    emb = (packed["word_emb"][x]
           + packed["pos_emb"][jnp.broadcast_to(pos, (B, S))]
           + packed["tok_emb"][segs])
    h = pallas_layernorm(emb.reshape(R, H), packed["emb_ln_g"],
                         packed["emb_ln_b"]).reshape(B, S, H)          # bf16

    # BertModel extended attention mask: (1 - mask) * -10000, broadcast over queries.
    mask_bias = ((1.0 - mask.astype(jnp.float32)) * -10000.0)[:, None, :]   # (B,1,S) f32

    I = packed["layers"][0]["wi"].shape[1]
    row_cands = (256, 128, 64, 32, 16, 8) if _SMALL_VMEM else (512, 256, 128, 64, 32, 16, 8)
    q_cands = (128, 64, 32, 16, 8) if _SMALL_VMEM else (256, 128, 64, 32, 16, 8)
    tr = _pick_tile(R, row_cands)        # row tile for QKV / FFN
    tq = _pick_tile(S, q_cands)          # q-row tile for attention
    ti = _ffn_inter_tile(H, I)           # FFN intermediate tile (== I when resident)

    for lp in packed["layers"]:
        # fused QKV projection over flattened rows, lane-dense (R, 3H) output
        qkv = pallas_qkv(h.reshape(R, H), lp["wqkv"], lp["bqkv"], tr)   # (R, 3H) bf16

        # per-layer head-layout moves in XLA glue (once per layer, not per q-tile):
        qkv5 = qkv.reshape(B, S, 3, nh, dh)
        qh = jnp.transpose(qkv5[:, :, 0], (0, 2, 1, 3))                 # (B, nh, S, dh)
        kT = jnp.transpose(qkv5[:, :, 1], (0, 2, 3, 1))                 # (B, nh, dh, S)
        vh = jnp.transpose(qkv5[:, :, 2], (0, 2, 1, 3))                 # (B, nh, S, dh)

        h1 = pallas_attention(h, qh, kT, vh, mask_bias, lp["wo_r"], lp["bo"],
                              lp["ln1g"], lp["ln1b"], tq)               # (B,S,H) bf16

        h = pallas_ffn(h1.reshape(R, H), lp["wi"], lp["bi"], lp["wp"], lp["bp"],
                       lp["ln2g"], lp["ln2b"], tr, ti).reshape(B, S, H)  # bf16

    return h.astype(jnp.float32)


# ---------------------------------------------------------------- pure-JAX reference
def _gelu_exact(x):
    return x * 0.5 * (1.0 + jax.lax.erf(x * (1.0 / math.sqrt(2.0))))


def bert_forward_ref(params, x, segs, mask, num_heads):
    B, S = x.shape
    H = params["word_emb"].shape[1]
    dh = H // num_heads
    pos = jnp.arange(S, dtype=jnp.int32)[None, :]
    emb = (params["word_emb"][x]
           + params["pos_emb"][jnp.broadcast_to(pos, (B, S))]
           + params["tok_emb"][segs])
    h = _layernorm(emb, params["emb_ln_g"], params["emb_ln_b"])
    mask_bias = ((1.0 - mask.astype(jnp.float32)) * -10000.0)[:, None, :]
    for p in params["layers"]:
        q = h @ p["wq"] + p["bq"]
        k = h @ p["wk"] + p["bk"]
        v = h @ p["wv"] + p["bv"]
        split = lambda t: t.reshape(B, S, num_heads, dh).transpose(0, 2, 1, 3)
        qh, kh, vh = split(q), split(k), split(v)
        s = jnp.einsum("bhqd,bhkd->bhqk", qh, kh) / math.sqrt(dh)
        s = s + mask_bias[:, None, :, :]
        attn = jax.nn.softmax(s, axis=-1)
        ctx = jnp.einsum("bhqk,bhkd->bhqd", attn, vh).transpose(0, 2, 1, 3).reshape(B, S, H)
        h1 = _layernorm(ctx @ p["wo"] + p["bo"] + h, p["ln1g"], p["ln1b"])
        inter = _gelu_exact(h1 @ p["wi"] + p["bi"])
        h = _layernorm(inter @ p["wp"] + p["bp"] + h1, p["ln2g"], p["ln2b"])
    return h


# ---------------------------------------------------------------- parameter init
def init_bert_params(key, *, vocab, max_pos, type_vocab, hidden, inter, num_layers):
    init_range = 0.02
    keys = iter(jax.random.split(key, 8 + num_layers * 8))

    def normal(shape):
        w = init_range * jax.random.normal(next(keys), shape)
        # store bf16-representable values so bf16 kernel weights match the f32 reference
        return w.astype(jnp.bfloat16).astype(jnp.float32)

    params = {
        "word_emb": normal((vocab, hidden)),
        "pos_emb": normal((max_pos, hidden)),
        "tok_emb": normal((type_vocab, hidden)),
        "emb_ln_g": jnp.ones((1, hidden), jnp.float32),
        "emb_ln_b": jnp.zeros((1, hidden), jnp.float32),
        "layers": [],
    }
    for _ in range(num_layers):
        layer = {
            "wq": normal((hidden, hidden)), "bq": jnp.zeros((1, hidden), jnp.float32),
            "wk": normal((hidden, hidden)), "bk": jnp.zeros((1, hidden), jnp.float32),
            "wv": normal((hidden, hidden)), "bv": jnp.zeros((1, hidden), jnp.float32),
            "wo": normal((hidden, hidden)), "bo": jnp.zeros((1, hidden), jnp.float32),
            "ln1g": jnp.ones((1, hidden), jnp.float32),
            "ln1b": jnp.zeros((1, hidden), jnp.float32),
            "wi": normal((hidden, inter)), "bi": jnp.zeros((1, inter), jnp.float32),
            "wp": normal((inter, hidden)), "bp": jnp.zeros((1, hidden), jnp.float32),
            "ln2g": jnp.ones((1, hidden), jnp.float32),
            "ln2b": jnp.zeros((1, hidden), jnp.float32),
        }
        params["layers"].append(layer)
    return params


# ---------------------------------------------------------------- main
if __name__ == "__main__":
    B, S, H, NH, I = 2, 8, 32, 4, 64
    VOCAB, MAX_POS, TYPE_VOCAB, LAYERS = 64, 16, 2, 2

    key = jax.random.PRNGKey(0)
    kp, kx, ks = jax.random.split(key, 3)

    params = init_bert_params(kp, vocab=VOCAB, max_pos=MAX_POS, type_vocab=TYPE_VOCAB,
                              hidden=H, inter=I, num_layers=LAYERS)
    packed = pack_bert_params(params, NH)   # hoisted: pack/cast weights once, not per forward

    x = jax.random.randint(kx, (B, S), 0, VOCAB, dtype=jnp.int32)       # token ids
    segs = jax.random.randint(ks, (B, S), 0, TYPE_VOCAB, dtype=jnp.int32)
    mask = jnp.ones((B, S), jnp.float32).at[1, 6:].set(0.0)             # pad last 2 of seq 1

    top_vec = bert_forward(packed, x, segs, mask)
    top_vec = jax.block_until_ready(top_vec)

    with jax.default_matmul_precision("highest"):
        ref = jax.block_until_ready(bert_forward_ref(params, x, segs, mask, NH))

    assert top_vec.shape == (B, S, H)
    assert bool(jnp.all(jnp.isfinite(top_vec)))
    # bf16 matmul inputs + bf16 inter-kernel activations + approx reciprocal + tanh-GELU
    # => relaxed tolerance (inference semantics)
    assert bool(jnp.allclose(top_vec, ref, atol=3e-2, rtol=3e-2))
    print("KERNEL_OK")
</pallas_src>

<mosaic_0001>
module attributes {stable_mosaic.version = 11 : i64} {
  func.func @layernorm_kernel(%arg0: i32, %arg1: memref<16x32xf32, #tpu.memory_space<vmem>>, %arg2: memref<1x32xf32, #tpu.memory_space<vmem>>, %arg3: memref<1x32xf32, #tpu.memory_space<vmem>>, %arg4: memref<16x32xbf16, #tpu.memory_space<vmem>>) attributes {dimension_semantics = [#tpu.dimension_semantics<parallel>], iteration_bounds = array<i64: 1>, scalar_prefetch = 0 : i64, scratch_operands = 0 : i64, tpu.core_type = #tpu.core_type<tc>, window_params = [{transform_indices = @transform_0, window_bounds = array<i64: 16, 32>}, {pipeline_mode = #tpu.pipeline_mode<synchronous>, transform_indices = @transform_1, window_bounds = array<i64: 1, 32>}, {pipeline_mode = #tpu.pipeline_mode<synchronous>, transform_indices = @transform_2, window_bounds = array<i64: 1, 32>}, {transform_indices = @transform_3, window_bounds = array<i64: 16, 32>}]} {
    %c0 = arith.constant 0 : index
    %c0_0 = arith.constant 0 : index
    %0 = vector.load %arg1[%c0, %c0_0] : memref<16x32xf32, #tpu.memory_space<vmem>>, vector<16x32xf32>
    %c0_1 = arith.constant 0 : index
    %c0_2 = arith.constant 0 : index
    %1 = vector.load %arg2[%c0_1, %c0_2] : memref<1x32xf32, #tpu.memory_space<vmem>>, vector<1x32xf32>
    %c0_3 = arith.constant 0 : index
    %c0_4 = arith.constant 0 : index
    %2 = vector.load %arg3[%c0_3, %c0_4] : memref<1x32xf32, #tpu.memory_space<vmem>>, vector<1x32xf32>
    %cst = arith.constant dense<0.000000e+00> : vector<16xf32>
    %3 = vector.multi_reduction <add>, %0, %cst [1] : vector<16x32xf32> to vector<16xf32>
    %4 = vector.shape_cast %3 : vector<16xf32> to vector<16x1xf32>
    %cst_5 = arith.constant 3.200000e+01 : f32
    %5 = vector.broadcast %cst_5 : f32 to vector<16x1xf32>
    %6 = arith.divf %4, %5 : vector<16x1xf32>
    %7 = vector.broadcast %6 : vector<16x1xf32> to vector<16x32xf32>
    %8 = arith.subf %0, %7 : vector<16x32xf32>
    %9 = arith.mulf %8, %8 : vector<16x32xf32>
    %cst_6 = arith.constant dense<0.000000e+00> : vector<16xf32>
    %10 = vector.multi_reduction <add>, %9, %cst_6 [1] : vector<16x32xf32> to vector<16xf32>
    %11 = vector.shape_cast %10 : vector<16xf32> to vector<16x1xf32>
    %cst_7 = arith.constant 3.200000e+01 : f32
    %12 = vector.broadcast %cst_7 : f32 to vector<16x1xf32>
    %13 = arith.divf %11, %12 : vector<16x1xf32>
    %14 = vector.broadcast %6 : vector<16x1xf32> to vector<16x32xf32>
    %15 = arith.subf %0, %14 : vector<16x32xf32>
    %cst_8 = arith.constant 9.99999996E-13 : f32
    %16 = vector.broadcast %cst_8 : f32 to vector<16x1xf32>
    %17 = arith.addf %13, %16 : vector<16x1xf32>
    %18 = math.rsqrt %17 : vector<16x1xf32>
    %19 = vector.broadcast %18 : vector<16x1xf32> to vector<16x32xf32>
    %20 = arith.mulf %15, %19 : vector<16x32xf32>
    %21 = vector.broadcast %1 : vector<1x32xf32> to vector<16x32xf32>
    %22 = arith.mulf %20, %21 : vector<16x32xf32>
    %23 = vector.broadcast %2 : vector<1x32xf32> to vector<16x32xf32>
    %24 = arith.addf %22, %23 : vector<16x32xf32>
    %25 = arith.truncf %24 : vector<16x32xf32> to vector<16x32xbf16>
    %c0_9 = arith.constant 0 : index
    %c0_10 = arith.constant 0 : index
    %26 = vector.load %arg4[%c0_9, %c0_10] : memref<16x32xbf16, #tpu.memory_space<vmem>>, vector<16x32xbf16>
    tpu.vector_store %arg4[%c0_9, %c0_10], %25 {strides = array<i32>} : memref<16x32xbf16, #tpu.memory_space<vmem>>, vector<16x32xbf16>,
    return
  }
  func.func @transform_0(%arg0: i32) -> (i32, i32) {
    %c0_i32 = arith.constant 0 : i32
    %c0_i32_0 = arith.constant 0 : i32
    return %arg0, %c0_i32 : i32, i32
  }
  func.func @transform_1(%arg0: i32) -> (i32, i32) {
    %c0_i32 = arith.constant 0 : i32
    %c0_i32_0 = arith.constant 0 : i32
    %c0_i32_1 = arith.constant 0 : i32
    return %c0_i32, %c0_i32_0 : i32, i32
  }
  func.func @transform_2(%arg0: i32) -> (i32, i32) {
    %c0_i32 = arith.constant 0 : i32
    %c0_i32_0 = arith.constant 0 : i32
    %c0_i32_1 = arith.constant 0 : i32
    return %c0_i32, %c0_i32_0 : i32, i32
  }
  func.func @transform_3(%arg0: i32) -> (i32, i32) {
    %c0_i32 = arith.constant 0 : i32
    %c0_i32_0 = arith.constant 0 : i32
    return %arg0, %c0_i32 : i32, i32
  }
}

</mosaic_0001>

<bundles_post_ra>
// kernel: tpu_custom_call.1
= control target key start
LH: loop header
LB: loop body
LE: loop exit
PB: predicated region body
PF: predicated region fallthrough
CT: control target
= control target key end

     0   :  { %8 = vsyncpa [#allocation3], 0  ;;  %s229_s0 = inlined_call_operand.hbm [shape: f32[16,32], index: 0, kind: input, shape index: {}]   ;;  %s230_s1 = inlined_call_operand.vmem [shape: f32[1,32], index: 1, kind: input, shape index: {}]   ;;  %s231_s2 = inlined_call_operand.vmem [shape: f32[1,32], index: 2, kind: input, shape index: {}]   ;;  %s232_s3 = inlined_call_operand.hbm [shape: bf16[16,32], index: 3, kind: output, shape index: {}]  }
   0x1   :  { %9 = vsyncpa [#allocation4], 0  ;;  %s169_s12 = smov [#allocation2]   ;;  %s121_s16 = scalar_lea.hbm %s229_s0, 256 }
   0x2   :  { %s15_s13 = sshll.u32 %s169_s12, 4  ;;  %p122_p0 = scmp.ne.s32.totalorder %s229_s0, %s121_s16  ;;  %s16_s13 = int_to_ptr.vmem [resolvable:$true] %s15_s13 }
   0x3   :  { %p125_p1 = scmp.lt.u32.totalorder %s121_s16, %s229_s0 }
   0x5   :  { %p127_p2 = pnand %p125_p1, %p122_p0 }
   0x7   :  { %130 = shalt.err (!%p127_p2)
}
   0x8   :  { %s131_s21 = scalar_lea.vmem %s16_s13, 256  ;;  %p136_p4 = scmp.lt.s32.totalorder %s16_s13, %s16_s13 }
   0x9   :  { %p132_p3 = scmp.ne.s32.totalorder %s16_s13, %s131_s21  ;;  %p137_p5 = scmp.lt.s32.totalorder %s131_s21, %s131_s21 }
   0xb   :  { %p138_p6 = por %p137_p5, %p136_p4 }
   0xd   :  { %p139_p7 = pnand %p138_p6, %p132_p3 }
   0xf   :  { %142 = shalt.err (!%p139_p7)
}
  0x10   :  { %s170_s22 = smov 128   ;;  %s171_s23 = smov 8  }
  0x11   :  { %21 = dma.hbm_to_vmem [thread:$0]  %s229_s0, 256, %s16_s13, [#allocation3], %s170_s22, %s170_s22, %s171_s23  }
  0x12   :  { %165 = dma.done.wait [#allocation3], 256  }
  0x13   :  { %166 = vsyncadd [#allocation3], 4294967040  ;;  %vm33_vm0 = vcmask 261120   ;;  %v29_v0 = vld [vmem:[#allocation2] sm:$0xff]  ;;  %v30_v1 = vld [vmem:[#allocation2 + $0x8] sm:$0xff]  ;;  %vm85_vm1 = vcmask 257024  }
  0x14   :  { %v34_v2 = vsel %vm33_vm0, %v29_v0, 0.0  ;;  %v37_v3 = vsel %vm33_vm0, %v30_v1, 0.0  ;;  %v105_v21 = vld [vmem:[%s230_s1] ss:$0 sm:$0xff]  ;;  %s172_s29 = smov [#allocation5]  }
  0x15   :  { %35 = vadd.xlane.f32.xlu0 %v34_v2  ;;  %v106_v23 = vld [vmem:[%s231_s2] ss:$0 sm:$0xff]  ;;  %s93_s30 = sshll.u32 %s172_s29, 4  ;;  %s94_s30 = int_to_ptr.vmem [resolvable:$true] %s93_s30 }
  0x16   :  { %s143_s1 = scalar_lea.vmem %s94_s30, 128  ;;  %p148_p9 = scmp.lt.s32.totalorder %s94_s30, %s94_s30 }
  0x17   :  { %p144_p8 = scmp.ne.s32.totalorder %s94_s30, %s143_s1  ;;  %p149_p10 = scmp.lt.s32.totalorder %s143_s1, %s143_s1 }
  0x19   :  { %38 = vadd.xlane.f32.xlu0 %v37_v3  ;;  %p150_p11 = por %p149_p10, %p148_p9 }
  0x1b   :  { %p151_p12 = pnand %p150_p11, %p144_p8 }
  0xa2   :  { %v36_v4 = vpop.xlane.xlu0 %35 }
  0xa3   :  { %v41_v5 = vmul.f32 0.03125, %v36_v4 }
  0xa5   :  { %v43_v6 = vsub.f32 %v29_v0, %v41_v5 }
  0xa6   :  { %v39_v7 = vpop.xlane.xlu0 %38 }
  0xa7   :  { %v42_v8 = vmul.f32 0.03125, %v39_v7  ;;  %v45_v9 = vmul.f32 %v43_v6, %v43_v6 }
  0xa9   :  { %v44_v10 = vsub.f32 %v30_v1, %v42_v8  ;;  %v47_v11 = vsel %vm33_vm0, %v45_v9, 0.0 }
  0xaa   :  { %48 = vadd.xlane.f32.xlu1 %v47_v11 }
  0xab   :  { %v46_v12 = vmul.f32 %v44_v10, %v44_v10 }
  0xad   :  { %v50_v13 = vsel %vm33_vm0, %v46_v12, 0.0 }
  0xae   :  { %51 = vadd.xlane.f32.xlu1 %v50_v13 }
 0x137   :  { %v49_v14 = vpop.xlane.xlu1 %48 }
 0x138   :  { %v53_v15 = vmul.f32 0.03125, %v49_v14 }
 0x13a   :  { %v55_v16 = vadd.f32 1e-12, %v53_v15 }
 0x13b   :  { %v52_v17 = vpop.xlane.xlu1 %51 }
 0x13c   :  { %117 = vrsqrt.f32 %v55_v16  ;;  %v54_v18 = vmul.f32 0.03125, %v52_v17 }
 0x13e   :  { %v56_v19 = vadd.f32 1e-12, %v54_v18 }
 0x140   :  { %119 = vrsqrt.f32 %v56_v19 }
 0x146   :  { %v118_v20 = vpop.eup %117 }
 0x147   :  { %v59_v22 = vmul.f32 %v118_v20, %v43_v6 }
 0x149   :  { %v67_v24 = vmul.f32 %v105_v21, %v59_v22 }
 0x14a   :  { %v120_v25 = vpop.eup %119 }
 0x14b   :  { %v60_v26 = vmul.f32 %v120_v25, %v44_v10  ;;  %v75_v27 = vadd.f32 %v106_v23, %v67_v24 }
 0x14d   :  { %v68_v28 = vmul.f32 %v105_v21, %v60_v26  ;;  %v109_v29 = vpack.c.bf16 %v75_v27, %v75_v27 }
 0x14f   :  { %v76_v30 = vadd.f32 %v106_v23, %v68_v28  ;;  %86 = vst.msk [vmem:[#allocation5] sm:$0xf] %vm85_vm1, %v109_v29 }
 0x151   :  { %v110_v31 = vpack.c.bf16 %v76_v30, %v76_v30 }
 0x153   :  { %87 = vst.msk [vmem:[#allocation5 + $0x4] sm:$0xf] %vm85_vm1, %v110_v31 }
 0x154   :  { %154 = shalt.err (!%p151_p12)
}
 0x155   :  { %s155_s5 = scalar_lea.hbm %s232_s3, 128 }
 0x156   :  { %p156_p13 = scmp.ne.s32.totalorder %s232_s3, %s155_s5  ;;  %p159_p0 = scmp.lt.u32.totalorder %s155_s5, %s232_s3 }
 0x158   :  { %p161_p1 = pnand %p159_p0, %p156_p13 }
 0x15a   :  { %164 = shalt.err (!%p161_p1)
}
 0x15b   :  { %s173_s10 = smov 64   ;;  %s174_s11 = smov 4  }
 0x15c   :  { %99 = dma.vmem_to_hbm [thread:$0]  %s94_s30, 128, %s232_s3, [#allocation4], %s173_s10, %s173_s10, %s174_s11  }
 0x15d   :  { %167 = dma.done.wait [#allocation4], 128  }
 0x15e   :  { %168 = vsyncadd [#allocation4], 4294967168 }
 0x15f   :  { %103 = vsyncpa [#allocation3], 1 }
 0x160   :  { %104 = vsyncpa [#allocation4], 1 }

</bundles_post_ra>
